<compile_context>
chip_gen: v5e
topology: v5e:2x2
jax: 0.10.0
libtpu: 0.0.40
codegen_flags: <defaults>
</compile_context>

<pallas_src>
import functools

import jax
import jax.numpy as jnp
from jax import lax
from jax.experimental import pallas as pl
from jax.experimental.pallas import tpu as pltpu


def _ar_loss_kernel(tok_sref, tgt_ref, emb_ref, w_ref, b_ref, loss_ref, h_ref,
                    *, inv_n):
    # tok_sref: (N,)    int32  SMEM  scalar-prefetched input token ids
    # tgt_ref:  (tn, 1) int32  VMEM  target ids for this row tile
    # emb_ref:  (V, D)  f32    VMEM  embedding table      (grid-invariant)
    # w_ref:    (D, V)  bf16   VMEM  head weight          (grid-invariant)
    # b_ref:    (1, V)  f32    VMEM  head bias            (grid-invariant)
    # loss_ref: (1, 1)  f32    VMEM  resident output accumulator
    # h_ref:    (tn, D) f32    VMEM  scratch: gathered embedding rows
    i = pl.program_id(0)
    tn = h_ref.shape[0]
    v = emb_ref.shape[0]
    base = i * tn

    # Embedding lookup: direct dynamic row gather (no one-hot MXU matmul).
    def gather_row(r, carry):
        t = tok_sref[base + r]
        h_ref[pl.ds(r, 1), :] = emb_ref[pl.ds(t, 1), :]
        return carry

    lax.fori_loop(0, tn, gather_row, 0)

    # Head projection on the MXU: bf16 operands, f32 accumulation.
    h = h_ref[...].astype(jnp.bfloat16)                                 # (tn, D)
    logits = jnp.dot(h, w_ref[...],
                     preferred_element_type=jnp.float32) + b_ref[...]   # (tn, V) f32

    # Numerically stable log-sum-exp over the vocab (lane) axis, all in f32.
    m = jnp.max(logits, axis=-1, keepdims=True)                         # (tn, 1)
    lse = m + jnp.log(jnp.sum(jnp.exp(logits - m), axis=-1, keepdims=True))

    # Target logit via lane mask + reduce (no full (tn, V) logp buffer).
    vocab_iota = lax.broadcasted_iota(jnp.int32, (tn, v), 1)
    tgt_logit = jnp.sum(jnp.where(vocab_iota == tgt_ref[...], logits, 0.0),
                        axis=-1, keepdims=True)                         # (tn, 1)

    tile_nll = jnp.sum(lse - tgt_logit, keepdims=True)                  # (1, 1)

    @pl.when(i == 0)
    def _():
        loss_ref[...] = jnp.zeros_like(loss_ref)

    loss_ref[...] += tile_nll

    @pl.when(i == pl.num_programs(0) - 1)
    def _():
        loss_ref[...] = loss_ref[...] * inv_n


def auto_regressive_wrapper_loss(x, emb, w_head, b_head, *, row_tile=128):
    """x: (B, S) int32 token ids.  Returns scalar mean cross-entropy loss."""
    input_seq = x[:, :-1]
    target_seq = x[:, 1:]
    B, T = input_seq.shape
    N = B * T
    V, D = emb.shape

    tn = min(row_tile, N)
    assert N % tn == 0, "flattened B*T rows must be a multiple of the row tile"
    num_tiles = N // tn

    tok = input_seq.reshape(N).astype(jnp.int32)       # -> SMEM (scalar prefetch)
    tgt = target_seq.reshape(N, 1).astype(jnp.int32)   # -> VMEM (tn, 1) column tiles
    emb_f32 = emb.astype(jnp.float32)                  # f32: safe dynamic row gather
    w_bf16 = w_head.astype(jnp.bfloat16)               # bf16 MXU operand
    b2d = b_head.reshape(1, V).astype(jnp.float32)

    kernel = functools.partial(_ar_loss_kernel, inv_n=1.0 / N)

    loss = pl.pallas_call(
        kernel,
        out_shape=jax.ShapeDtypeStruct((1, 1), jnp.float32),
        grid_spec=pltpu.PrefetchScalarGridSpec(
            num_scalar_prefetch=1,
            grid=(num_tiles,),
            in_specs=[
                pl.BlockSpec((tn, 1), lambda i, tok: (i, 0)),   # targets (streamed)
                pl.BlockSpec((V, D), lambda i, tok: (0, 0)),    # embedding (resident)
                pl.BlockSpec((D, V), lambda i, tok: (0, 0)),    # head weight (resident)
                pl.BlockSpec((1, V), lambda i, tok: (0, 0)),    # head bias (resident)
            ],
            out_specs=pl.BlockSpec((1, 1), lambda i, tok: (0, 0)),
            scratch_shapes=[pltpu.VMEM((tn, D), jnp.float32)],
        ),
        compiler_params=pltpu.CompilerParams(
            # The row-tile axis reduces into the resident (1,1) accumulator, so it
            # must be "arbitrary" (a parallel marking would break the accumulation).
            dimension_semantics=("arbitrary",),
            vmem_limit_bytes=32 * 1024 * 1024,
        ),
    )(tok, tgt, emb_f32, w_bf16, b2d)
    return loss[0, 0]


def _reference_loss(x, emb, w_head, b_head):
    inp, tgt = x[:, :-1], x[:, 1:]
    h = emb[inp]                                  # (B, T, D)
    logits = h @ w_head + b_head                  # (B, T, V)
    logp = jax.nn.log_softmax(logits, axis=-1)
    nll = -jnp.take_along_axis(logp, tgt[..., None], axis=-1)[..., 0]
    return jnp.mean(nll)


if __name__ == "__main__":
    key = jax.random.PRNGKey(0)
    k_tok, k_emb, k_w, k_b = jax.random.split(key, 4)

    B, S = 2, 129        # x has S tokens -> T = S-1 = 128 prediction positions
    V, D = 256, 128      # vocab (lane-aligned), hidden (MXU-friendly)

    x = jax.random.randint(k_tok, (B, S), 0, V, dtype=jnp.int32)
    emb = jax.random.normal(k_emb, (V, D), dtype=jnp.float32) * 0.5
    w_head = jax.random.normal(k_w, (D, V), dtype=jnp.float32) * 0.5
    b_head = jax.random.normal(k_b, (V,), dtype=jnp.float32) * 0.1

    loss = auto_regressive_wrapper_loss(x, emb, w_head, b_head)
    jax.block_until_ready(loss)

    ref = _reference_loss(x, emb, w_head, b_head)
    assert jnp.allclose(loss, ref, rtol=5e-2, atol=5e-2), (loss, ref)

    # TODO(synk): `generate` (top-k filtering + multinomial sampling loop) is
    # inference-time host control flow, not part of forward(); not ported.
    print("KERNEL_OK")
</pallas_src>

<mosaic_0001>
module attributes {stable_mosaic.version = 11 : i64} {
  func.func @_ar_loss_kernel(%arg0: i32, %arg1: memref<256xi32, #tpu.memory_space<smem>>, %arg2: memref<128x1xi32, #tpu.memory_space<vmem>>, %arg3: memref<256x128xf32, #tpu.memory_space<vmem>>, %arg4: memref<128x256xbf16, #tpu.memory_space<vmem>>, %arg5: memref<1x256xf32, #tpu.memory_space<vmem>>, %arg6: memref<1x1xf32, #tpu.memory_space<vmem>>, %arg7: memref<128x128xf32, #tpu.memory_space<vmem>>) attributes {dimension_semantics = [#tpu.dimension_semantics<arbitrary>], iteration_bounds = array<i64: 2>, scalar_prefetch = 1 : i64, scratch_operands = 1 : i64, tpu.core_type = #tpu.core_type<tc>, window_params = [{transform_indices = @transform_0, window_bounds = array<i64: 128, 1>}, {pipeline_mode = #tpu.pipeline_mode<synchronous>, transform_indices = @transform_1, window_bounds = array<i64: 256, 128>}, {pipeline_mode = #tpu.pipeline_mode<synchronous>, transform_indices = @transform_2, window_bounds = array<i64: 128, 256>}, {pipeline_mode = #tpu.pipeline_mode<synchronous>, transform_indices = @transform_3, window_bounds = array<i64: 1, 256>}, {pipeline_mode = #tpu.pipeline_mode<synchronous>, transform_indices = @transform_4, window_bounds = array<i64: 1, 1>}]} {
    %c128_i32 = arith.constant 128 : i32
    %0 = arith.muli %arg0, %c128_i32 : i32
    %c0_i32 = arith.constant 0 : i32
    %c128_i32_0 = arith.constant 128 : i32
    %1 = arith.addi %c0_i32, %c128_i32_0 : i32
    %c1_i32 = arith.constant 1 : i32
    scf.for %arg8 = %c0_i32 to %1 step %c1_i32  : i32 {
      %41 = arith.addi %0, %arg8 : i32
      %42 = arith.index_cast %41 : i32 to index
      %43 = memref.load %arg1[%42] : memref<256xi32, #tpu.memory_space<smem>>
      %44 = arith.index_cast %43 : i32 to index
      %c0_22 = arith.constant 0 : index
      %45 = vector.load %arg3[%44, %c0_22] : memref<256x128xf32, #tpu.memory_space<vmem>>, vector<1x128xf32>
      %46 = arith.index_cast %arg8 : i32 to index
      %c0_23 = arith.constant 0 : index
      %47 = vector.load %arg7[%46, %c0_23] : memref<128x128xf32, #tpu.memory_space<vmem>>, vector<1x128xf32>
      tpu.vector_store %arg7[%46, %c0_23], %45 {strides = array<i32>} : memref<128x128xf32, #tpu.memory_space<vmem>>, vector<1x128xf32>,
    }
    %c128_i32_1 = arith.constant 128 : i32
    %c0 = arith.constant 0 : index
    %c0_2 = arith.constant 0 : index
    %2 = vector.load %arg7[%c0, %c0_2] : memref<128x128xf32, #tpu.memory_space<vmem>>, vector<128x128xf32>
    %3 = arith.truncf %2 : vector<128x128xf32> to vector<128x128xbf16>
    %c0_3 = arith.constant 0 : index
    %c0_4 = arith.constant 0 : index
    %4 = vector.load %arg4[%c0_3, %c0_4] : memref<128x256xbf16, #tpu.memory_space<vmem>>, vector<128x256xbf16>
    %cst = arith.constant dense<0.000000e+00> : vector<128x256xf32>
    %5 = tpu.matmul %3, %4, %cst {dimension_numbers = #tpu.dot_dimension_numbers<[1], [0], [0], [1], [0, 0, 1, 1], [], []>} : vector<128x128xbf16>, vector<128x256xbf16>, vector<128x256xf32> -> vector<128x256xf32>
    %c0_5 = arith.constant 0 : index
    %c0_6 = arith.constant 0 : index
    %6 = vector.load %arg5[%c0_5, %c0_6] : memref<1x256xf32, #tpu.memory_space<vmem>>, vector<1x256xf32>
    %7 = vector.broadcast %6 : vector<1x256xf32> to vector<128x256xf32>
    %8 = arith.addf %5, %7 : vector<128x256xf32>
    %cst_7 = arith.constant dense<0xFF800000> : vector<128xf32>
    %9 = vector.multi_reduction <maximumf>, %8, %cst_7 [1] : vector<128x256xf32> to vector<128xf32>
    %10 = vector.shape_cast %9 : vector<128xf32> to vector<128x1xf32>
    %11 = vector.broadcast %10 : vector<128x1xf32> to vector<128x256xf32>
    %12 = arith.subf %8, %11 : vector<128x256xf32>
    %13 = math.exp %12 : vector<128x256xf32>
    %cst_8 = arith.constant dense<0.000000e+00> : vector<128xf32>
    %14 = vector.multi_reduction <add>, %13, %cst_8 [1] : vector<128x256xf32> to vector<128xf32>
    %15 = vector.shape_cast %14 : vector<128xf32> to vector<128x1xf32>
    %16 = math.log %15 : vector<128x1xf32>
    %17 = arith.addf %10, %16 : vector<128x1xf32>
    %18 = tpu.iota {dimensions = array<i32: 1>} : vector<128x256xi32>
    %c0_9 = arith.constant 0 : index
    %c0_10 = arith.constant 0 : index
    %19 = vector.load %arg2[%c0_9, %c0_10] : memref<128x1xi32, #tpu.memory_space<vmem>>, vector<128x1xi32>
    %20 = vector.broadcast %19 : vector<128x1xi32> to vector<128x256xi32>
    %21 = arith.cmpi eq, %18, %20 : vector<128x256xi32>
    %cst_11 = arith.constant 0.000000e+00 : f32
    %22 = vector.broadcast %cst_11 : f32 to vector<128x256xf32>
    %23 = arith.select %21, %8, %22 : vector<128x256xi1>, vector<128x256xf32>
    %cst_12 = arith.constant dense<0.000000e+00> : vector<128xf32>
    %24 = vector.multi_reduction <add>, %23, %cst_12 [1] : vector<128x256xf32> to vector<128xf32>
    %25 = vector.shape_cast %24 : vector<128xf32> to vector<128x1xf32>
    %26 = arith.subf %17, %25 : vector<128x1xf32>
    %27 = vector.shape_cast %26 : vector<128x1xf32> to vector<1x128x1xf32>
    %cst_13 = arith.constant dense<0.000000e+00> : vector<1xf32>
    %28 = vector.multi_reduction <add>, %27, %cst_13 [1, 2] : vector<1x128x1xf32> to vector<1xf32>
    %29 = vector.shape_cast %28 : vector<1xf32> to vector<1x1x1xf32>
    %30 = vector.extract %29[0, 0, 0] : f32 from vector<1x1x1xf32>
    %31 = vector.broadcast %30 : f32 to vector<1x1xf32>
    %c0_i32_14 = arith.constant 0 : i32
    %32 = arith.cmpi eq, %arg0, %c0_i32_14 : i32
    %33 = arith.extui %32 : i1 to i32
    %c0_i32_15 = arith.constant 0 : i32
    %34 = arith.cmpi ne, %33, %c0_i32_15 : i32
    scf.if %34 {
      %cst_22 = arith.constant 0.000000e+00 : f32
      %41 = vector.broadcast %cst_22 : f32 to vector<1x1xf32>
      %c0_23 = arith.constant 0 : index
      %c0_24 = arith.constant 0 : index
      %42 = vector.load %arg6[%c0_23, %c0_24] : memref<1x1xf32, #tpu.memory_space<vmem>>, vector<1x1xf32>
      tpu.vector_store %arg6[%c0_23, %c0_24], %41 {strides = array<i32>} : memref<1x1xf32, #tpu.memory_space<vmem>>, vector<1x1xf32>,
    } else {
    }
    %c0_16 = arith.constant 0 : index
    %c0_17 = arith.constant 0 : index
    %35 = vector.load %arg6[%c0_16, %c0_17] : memref<1x1xf32, #tpu.memory_space<vmem>>, vector<1x1xf32>
    %36 = arith.addf %35, %31 : vector<1x1xf32>
    %c0_18 = arith.constant 0 : index
    %c0_19 = arith.constant 0 : index
    %37 = vector.load %arg6[%c0_18, %c0_19] : memref<1x1xf32, #tpu.memory_space<vmem>>, vector<1x1xf32>
    tpu.vector_store %arg6[%c0_18, %c0_19], %36 {strides = array<i32>} : memref<1x1xf32, #tpu.memory_space<vmem>>, vector<1x1xf32>,
    %c1_i32_20 = arith.constant 1 : i32
    %38 = arith.cmpi eq, %arg0, %c1_i32_20 : i32
    %39 = arith.extui %38 : i1 to i32
    %c0_i32_21 = arith.constant 0 : i32
    %40 = arith.cmpi ne, %39, %c0_i32_21 : i32
    scf.if %40 {
      %c0_22 = arith.constant 0 : index
      %c0_23 = arith.constant 0 : index
      %41 = vector.load %arg6[%c0_22, %c0_23] : memref<1x1xf32, #tpu.memory_space<vmem>>, vector<1x1xf32>
      %cst_24 = arith.constant 3.906250e-03 : f32
      %42 = vector.broadcast %cst_24 : f32 to vector<1x1xf32>
      %43 = arith.mulf %41, %42 : vector<1x1xf32>
      %c0_25 = arith.constant 0 : index
      %c0_26 = arith.constant 0 : index
      %44 = vector.load %arg6[%c0_25, %c0_26] : memref<1x1xf32, #tpu.memory_space<vmem>>, vector<1x1xf32>
      tpu.vector_store %arg6[%c0_25, %c0_26], %43 {strides = array<i32>} : memref<1x1xf32, #tpu.memory_space<vmem>>, vector<1x1xf32>,
    } else {
    }
    return
  }
  func.func @transform_0(%arg0: i32, %arg1: memref<256xi32, #tpu.memory_space<smem>>) -> (i32, i32) {
    %c0_i32 = arith.constant 0 : i32
    %c0_i32_0 = arith.constant 0 : i32
    return %arg0, %c0_i32 : i32, i32
  }
  func.func @transform_1(%arg0: i32, %arg1: memref<256xi32, #tpu.memory_space<smem>>) -> (i32, i32) {
    %c0_i32 = arith.constant 0 : i32
    %c0_i32_0 = arith.constant 0 : i32
    %c0_i32_1 = arith.constant 0 : i32
    return %c0_i32, %c0_i32_0 : i32, i32
  }
  func.func @transform_2(%arg0: i32, %arg1: memref<256xi32, #tpu.memory_space<smem>>) -> (i32, i32) {
    %c0_i32 = arith.constant 0 : i32
    %c0_i32_0 = arith.constant 0 : i32
    %c0_i32_1 = arith.constant 0 : i32
    return %c0_i32, %c0_i32_0 : i32, i32
  }
  func.func @transform_3(%arg0: i32, %arg1: memref<256xi32, #tpu.memory_space<smem>>) -> (i32, i32) {
    %c0_i32 = arith.constant 0 : i32
    %c0_i32_0 = arith.constant 0 : i32
    %c0_i32_1 = arith.constant 0 : i32
    return %c0_i32, %c0_i32_0 : i32, i32
  }
  func.func @transform_4(%arg0: i32, %arg1: memref<256xi32, #tpu.memory_space<smem>>) -> (i32, i32) {
    %c0_i32 = arith.constant 0 : i32
    %c0_i32_0 = arith.constant 0 : i32
    %c0_i32_1 = arith.constant 0 : i32
    return %c0_i32, %c0_i32_0 : i32, i32
  }
}

</mosaic_0001>

<bundles_post_ra>
// kernel: tpu_custom_call.1
= control target key start
LH: loop header
LB: loop body
LE: loop exit
PB: predicated region body
PF: predicated region fallthrough
CT: control target
= control target key end

     0   :  { %s1357_s21 = smov [#allocation4]   ;;  %s1826_s0 = inlined_call_operand.vmem [shape: s32[256], index: 0, kind: input, shape index: {}]   ;;  %s1827_s1 = inlined_call_operand.vmem [shape: s32[256,1], index: 1, kind: input, shape index: {}]   ;;  %s1828_s2 = inlined_call_operand.vmem [shape: f32[256,128], index: 2, kind: input, shape index: {}]   ;;  %s1829_s3 = inlined_call_operand.hbm [shape: bf16[128,256], index: 3, kind: input, shape index: {}]   ;;  %s1830_s4 = inlined_call_operand.vmem [shape: f32[1,256], index: 4, kind: input, shape index: {}]   ;;  %s1831_s5 = inlined_call_operand.hbm [shape: f32[1,1], index: 5, kind: output, shape index: {}]  }
   0x1   :  { %s11_s20 = sshll.u32 %s1826_s0, 4  ;;  %s12_s20 = int_to_ptr.vmem [resolvable:$true] %s11_s20 }
   0x2   :  { %14 = dma.vmem_to_smem %s12_s20, 32, %s1357_s21, [#allocation3] }
   0x3   :  { %1339 = dma.done.wait [#allocation3], 32 }
   0x4   :  { %1340 = vsyncadd [#allocation3], 4294967264 }
   0x5   :  { %17 = sfence }
   0x6   :  { %18 = vsyncpa [#allocation6], 0 }
   0x7   :  { %19 = vsyncpa [#allocation7], 0  ;;  %s1397_s22 = smov 0  }
   0x8 LB: > { %s154_s0 = sshll.u32 %s1829_s3, 4  ;;  %s1406_s25 = sadd.s32 4294967295, %s1351_s22   ;;  %s1351_s22 = sphi %s1397_s22, %s25_s22   ;;  %s155_s0 = int_to_ptr.hbm [resolvable:$true] %s154_s0 }
   0x9   : > { %p1011_p0 = scmp.ge.s32.totalorder %s1351_s22, 1  ;;  %p140_p1 = scmp.lt.s32.totalorder %s1351_s22, 3 }
   0xa   : > { %p1012_p2 = scmp.ne.s32.totalorder %s1406_s25, 0  ;;  %p1135_p3 = scmp.eq.s32.totalorder %s1406_s25, 0 }
   0xb   : > { %p141_p4 = pnand %p1011_p0, %p140_p1  ;;  %s1358_s26 = smov [#allocation5]  }
   0xc   : > { %s156_s27 = sshll.u32 %s1358_s26, 4  ;;  %s1359_s28 = smov 128   ;;  %s157_s27 = int_to_ptr.vmem [resolvable:$true] %s156_s27 }
   0xd   : > { %p1131_p5 = pneg %p141_p4  ;;  %s1360_s29 = smov 8  }
   0xe   : > { %184 = sbr.rel (%p141_p4) target bundleno = 753 (0x2f1), region = 36 }
   0xf   : > { %p1132_p6 = pnand %p1135_p3, %p1131_p5 }
  0x11   : > { %1134 = dma.hbm_to_vmem [thread:$0]  (!%p1132_p6), %s155_s0, 2048, %s157_s27, [#allocation6], %s1359_s28, %s1359_s28, %s1360_s29  }
  0x13   : > { %1342 = dma.done.wait (%p1135_p3), [#allocation6], 2048  }
  0x14   : > { %1344 = vsyncadd (%p1135_p3), [#allocation6], 4294965248  ;;  %s1016_s30 = sshll.u32 %s1406_s25, 4  ;;  %s1018_s6 = sshll.u32 %s1406_s25, 7 }
  0x15   : > { %p207_p7 = scmp.lt.s32.totalorder %s1016_s30, 31  ;;  %s1353_s11 = smov 0  }
  0x17   : > { %s1833_s30 = smov (!%p207_p7, %s1016_s30), 31 }
  0x18   : > { %s1017_s7 = sshll.u32 %s1833_s30, 3 }
  0x19   : > { %s1417_s10 = scalar_lea.vmem %s1827_s1, %s1017_s7 }
  0x1a LB: >> { %s219_s12 = sadd.s32 %s1355_s11, %s1018_s6  ;;  %s223_s17 = scalar_lea.vmem [#allocation2], %s1355_s11  ;;  %s1355_s11 = sphi %s1353_s11, %s218_s11  }
  0x1b   : >> { %s220_s13 = sld [smem:[#allocation4 + %s219_s12]]  ;;  %s218_s11 = sadd.s32 1, %s1355_s11  }
  0x1c   : >> { %p215_p8 = scmp.ge.s32.totalorder %s218_s11, 128  }
  0x1d   : > { %v1077_v1 = vld [vmem:[#allocation5 + $0x70] sm:$0xf] (%p215_p8)  ;;  %v1104_v2 = vld [vmem:[#allocation5 + $0x74] sm:$0xf0] (%p215_p8)  ;;  %v1103_v3 = vld [vmem:[#allocation5 + $0x74] sm:$0xf] (%p215_p8) }
  0x1e   : > { %v1078_v4 = vor.u32 (%p215_p8), %v1104_v2, %v1077_v1  ;;  %v1079_v5 = vld [vmem:[#allocation5 + $0x78] sm:$0xf0] (%p215_p8)  ;;  %v1069_v6 = vld [vmem:[#allocation5 + $0x60] sm:$0xf] (%p215_p8)  ;;  %v1102_v7 = vld [vmem:[#allocation5 + $0x64] sm:$0xf0] (%p215_p8) }
  0x1f   : > { %217 = sbr.rel (!%p215_p8) target bundleno = 26 (0x1a), region = 85  ;;  %v1082_v8 = vor.u32 (%p215_p8), %v1103_v3, %v1079_v5  ;;  %v1101_v9 = vld [vmem:[#allocation5 + $0x64] sm:$0xf] (%p215_p8)  ;;  %v1071_v10 = vld [vmem:[#allocation5 + $0x68] sm:$0xf0] (%p215_p8)  ;;  %v1070_v11 = vor.u32 (%p215_p8), %v1102_v7, %v1069_v6  ;;  %v1361_v24 = vmov (%p215_p8), 0  }
  0x20   : > { %351 = vmatpush.bf16.msra.mxu0 (%p215_p8), %v1078_v4  ;;  %1105 = vmatpush.bf16.msra.mxu2 (%p215_p8), %v1078_v4  ;;  %v1074_v12 = vor.u32 (%p215_p8), %v1101_v9, %v1071_v10  ;;  %v1061_v13 = vld [vmem:[#allocation5 + $0x50] sm:$0xf] (%p215_p8)  ;;  %v1100_v14 = vld [vmem:[#allocation5 + $0x54] sm:$0xf0] (%p215_p8)  ;;  %v1099_v15 = vld [vmem:[#allocation5 + $0x54] sm:$0xf] (%p215_p8) }
  0x21   : >> { %s221_s16 = scalar_lea.vmem %s1828_s2, %s220_s13  ;;  %400 = vmatpush.bf16.msra.mxu1 (%p215_p8), %v1082_v8  ;;  %1113 = vmatpush.bf16.msra.mxu3 (%p215_p8), %v1082_v8  ;;  %v1063_v16 = vld [vmem:[#allocation5 + $0x58] sm:$0xf0] (%p215_p8)  ;;  %v1062_v17 = vor.u32 (%p215_p8), %v1100_v14, %v1061_v13  ;;  %v1053_v19 = vld [vmem:[#allocation5 + $0x40] sm:$0xf] (%p215_p8)  ;;  %v1098_v20 = vld [vmem:[#allocation5 + $0x44] sm:$0xf0] (%p215_p8) }
  0x22   : >> { %v222_v0 = vld [vmem:[%s221_s16] sm:$0x1]  ;;  %v1066_v18 = vor.u32 (%p215_p8), %v1099_v15, %v1063_v16  ;;  %v693_v21 = vld [vmem:[%s1417_s10 + $0x8] sm:$0xff] (%p215_p8)  ;;  %v1097_v22 = vld [vmem:[#allocation5 + $0x44] sm:$0xf] (%p215_p8)  ;;  %1163 = vset.pattern.permute.xlu1 (%p215_p8), %v1361_v24  ;;  %1162 = vset.pattern.permute.xlu0 (%p215_p8), %v1361_v24  ;;  %v1054_v25 = vor.u32 (%p215_p8), %v1098_v20, %v1053_v19 }
  0x23   : >> { %224 = vst [vmem:[%s223_s17] sm:$0x1] %v222_v0  ;;  %v1055_v23 = vld [vmem:[#allocation5 + $0x48] sm:$0xf0] (%p215_p8)  ;;  %712 = vperm.xlu1 (%p215_p8), %1163, %v693_v21   ;;  %1164 = vset.pattern.permute.xlu2 (%p215_p8), %v1361_v24  ;;  %v1045_v27 = vld [vmem:[#allocation5 + $0x30] sm:$0xf] (%p215_p8)  ;;  %v692_v29 = vld [vmem:[%s1417_s10] sm:$0xff] (%p215_p8) }
  0x24   : > { %352 = vmatpush.bf16.msra.mxu0 %v1070_v11  ;;  %1106 = vmatpush.bf16.msra.mxu2 %v1070_v11  ;;  %v1058_v26 = vor.u32 %v1097_v22, %v1055_v23  ;;  %v1096_v28 = vld [vmem:[#allocation5 + $0x34] sm:$0xf0]  ;;  %v1095_v30 = vld [vmem:[#allocation5 + $0x34] sm:$0xf]  ;;  %v1047_v31 = vld [vmem:[#allocation5 + $0x38] sm:$0xf0] }
  0x25   : > { %401 = vmatpush.bf16.msra.mxu1 %v1074_v12  ;;  %1114 = vmatpush.bf16.msra.mxu3 %v1074_v12  ;;  %v1046_v32 = vor.u32 %v1096_v28, %v1045_v27  ;;  %v696_v33 = vld [vmem:[%s1417_s10 + $0x20] sm:$0xff]  ;;  %v1050_v34 = vor.u32 %v1095_v30, %v1047_v31  ;;  %v1094_v36 = vld [vmem:[#allocation5 + $0x24] sm:$0xf0]  ;;  %v1039_v38 = vld [vmem:[#allocation5 + $0x28] sm:$0xf0] }
  0x26   : > { %709 = vperm.xlu0 %1162, %v692_v29   ;;  %v1037_v35 = vld [vmem:[#allocation5 + $0x20] sm:$0xf]  ;;  %v1093_v37 = vld [vmem:[#allocation5 + $0x24] sm:$0xf]  ;;  %v698_v39 = vld [vmem:[%s1417_s10 + $0x30] sm:$0xff] }
  0x27   : > { %v1038_v40 = vor.u32 %v1094_v36, %v1037_v35  ;;  %v1042_v41 = vor.u32 %v1093_v37, %v1039_v38  ;;  %v1029_v42 = vld [vmem:[#allocation5 + $0x10] sm:$0xf]  ;;  %v1092_v43 = vld [vmem:[#allocation5 + $0x14] sm:$0xf0]  ;;  %v1091_v44 = vld [vmem:[#allocation5 + $0x14] sm:$0xf] }
  0x28   : > { %353 = vmatpush.bf16.msra.mxu0 %v1062_v17  ;;  %1107 = vmatpush.bf16.msra.mxu2 %v1062_v17  ;;  %v1031_v45 = vld [vmem:[#allocation5 + $0x18] sm:$0xf0]  ;;  %v1030_v46 = vor.u32 %v1092_v43, %v1029_v42  ;;  %v697_v47 = vld [vmem:[%s1417_s10 + $0x28] sm:$0xff]  ;;  %v1021_v49 = vld [vmem:[#allocation5] sm:$0xf] }
  0x29   : > { %402 = vmatpush.bf16.msra.mxu1 %v1066_v18  ;;  %1115 = vmatpush.bf16.msra.mxu3 %v1066_v18  ;;  %v1034_v48 = vor.u32 %v1091_v44, %v1031_v45  ;;  %v1090_v50 = vld [vmem:[#allocation5 + $0x4] sm:$0xf0]  ;;  %v1089_v51 = vld [vmem:[#allocation5 + $0x4] sm:$0xf]  ;;  %v1023_v52 = vld [vmem:[#allocation5 + $0x8] sm:$0xf0] }
  0x2a   : > { %v225_v53 = vld [vmem:[#allocation2] sm:$0xff]  ;;  %v1022_v55 = vor.u32 %v1090_v50, %v1021_v49  ;;  %v226_v56 = vld [vmem:[#allocation2 + $0x8] sm:$0xff]  ;;  %v1026_v59 = vor.u32 %v1089_v51, %v1023_v52  ;;  %v699_v62 = vld [vmem:[%s1417_s10 + $0x38] sm:$0xff] }
  0x2b   : > { %721 = vperm.xlu1 %1163, %v696_v33   ;;  %v700_v54 = vld [vmem:[%s1417_s10 + $0x40] sm:$0xff]  ;;  %v234_v58 = vld [vmem:[#allocation2 + $0x48] sm:$0xff]  ;;  %v241_v60 = vpack.c.bf16 %v226_v56, %v225_v53  ;;  %v702_v63 = vld [vmem:[%s1417_s10 + $0x50] sm:$0xff] }
  0x2c   : > { %354 = vmatpush.bf16.msra.mxu0 %v1054_v25  ;;  %1108 = vmatpush.bf16.msra.mxu2 %v1054_v25  ;;  %v233_v57 = vld [vmem:[#allocation2 + $0x40] sm:$0xff]  ;;  %v701_v0 = vld [vmem:[%s1417_s10 + $0x48] sm:$0xff]  ;;  %v227_v1 = vld [vmem:[#allocation2 + $0x10] sm:$0xff] }
  0x2d   : > { %403 = vmatpush.bf16.msra.mxu1 %v1058_v26  ;;  %1116 = vmatpush.bf16.msra.mxu3 %v1058_v26  ;;  %v245_v61 = vpack.c.bf16 %v234_v58, %v233_v57  ;;  %v228_v2 = vld [vmem:[#allocation2 + $0x18] sm:$0xff]  ;;  %v235_v3 = vld [vmem:[#allocation2 + $0x50] sm:$0xff]  ;;  %v704_v8 = vld [vmem:[%s1417_s10 + $0x60] sm:$0xff] }
  0x2e   : > { %727 = vperm.xlu0 %1162, %v698_v39   ;;  %v236_v4 = vld [vmem:[#allocation2 + $0x58] sm:$0xff]  ;;  %v242_v5 = vpack.c.bf16 %v228_v2, %v227_v1  ;;  %v694_v9 = vld [vmem:[%s1417_s10 + $0x10] sm:$0xff]  ;;  %v705_v10 = vld [vmem:[%s1417_s10 + $0x68] sm:$0xff] }
  0x2f   : > { %v246_v6 = vpack.c.bf16 %v236_v4, %v235_v3  ;;  %v703_v7 = vld [vmem:[%s1417_s10 + $0x58] sm:$0xff]  ;;  %715 = vperm.xlu2 %1164, %v694_v9   ;;  %v229_v11 = vld [vmem:[#allocation2 + $0x20] sm:$0xff]  ;;  %v230_v13 = vld [vmem:[#allocation2 + $0x28] sm:$0xff] }
  0x30   : > { %355 = vmatpush.bf16.msra.mxu0 %v1046_v32  ;;  %1109 = vmatpush.bf16.msra.mxu2 %v1046_v32  ;;  %v695_v12 = vld [vmem:[%s1417_s10 + $0x18] sm:$0xff]  ;;  %v237_v14 = vld [vmem:[#allocation2 + $0x60] sm:$0xff]  ;;  %v238_v15 = vld [vmem:[#allocation2 + $0x68] sm:$0xff]  ;;  %v243_v16 = vpack.c.bf16 %v230_v13, %v229_v11 }
  0x31   : > { %404 = vmatpush.bf16.msra.mxu1 %v1050_v34  ;;  %1117 = vmatpush.bf16.msra.mxu3 %v1050_v34  ;;  %v247_v17 = vpack.c.bf16 %v238_v15, %v237_v14  ;;  %v231_v18 = vld [vmem:[#allocation2 + $0x30] sm:$0xff]  ;;  %v232_v19 = vld [vmem:[#allocation2 + $0x38] sm:$0xff]  ;;  %v265_v24 = vld [vmem:[%s1830_s4] sm:$0x3] }
  0x32   : > { %v239_v20 = vld [vmem:[#allocation2 + $0x70] sm:$0xff]  ;;  %v240_v21 = vld [vmem:[#allocation2 + $0x78] sm:$0xff]  ;;  %v244_v22 = vpack.c.bf16 %v232_v19, %v231_v18  ;;  %v1439_v25 = vperm.slane %v265_v24, 0  ;;  %v1441_v26 = vperm.slane %v265_v24, 1 }
  0x33   : > { %724 = vperm.xlu1 %1163, %v697_v47   ;;  %v248_v23 = vpack.c.bf16 %v240_v21, %v239_v20  ;;  %v689_v20 = vlaneseq }
  0x34   : > { %356 = vmatpush.bf16.msra.mxu0 %v1038_v40  ;;  %1110 = vmatpush.bf16.msra.mxu2 %v1038_v40 }
  0x35   : > { %405 = vmatpush.bf16.msra.mxu1 %v1042_v41  ;;  %1118 = vmatpush.bf16.msra.mxu3 %v1042_v41 }
  0x36   : > { %733 = vperm.xlu0 %1162, %v700_v54  }
  0x37   : > { %718 = vperm.xlu2 %1164, %v695_v12  }
  0x38   : > { %357 = vmatpush.bf16.msra.mxu0 %v1030_v46  ;;  %1111 = vmatpush.bf16.msra.mxu2 %v1030_v46 }
  0x39   : > { %406 = vmatpush.bf16.msra.mxu1 %v1034_v48  ;;  %1119 = vmatpush.bf16.msra.mxu3 %v1034_v48 }
  0x3b   : > { %730 = vperm.xlu1 %1163, %v699_v62  }
  0x3c   : > { %358 = vmatpush.bf16.msra.mxu0 %v1022_v55  ;;  %1112 = vmatpush.bf16.msra.mxu2 %v1022_v55 }
  0x3d   : > { %407 = vmatpush.bf16.msra.mxu1 %v1026_v59  ;;  %1120 = vmatpush.bf16.msra.mxu3 %v1026_v59 }
  0x3e   : > { %739 = vperm.xlu0 %1162, %v702_v63  }
  0x3f   : > { %359 = vmatmul.bf16.vlgmr.msra.gmra.mxu0 %v241_v60  ;;  %379 = vmatmul.bf16.vlgmr.msra.gmra.mxu2 %v245_v61 }
  0x40   : > { %408 = vmatmul.bf16.vlgmr.msra.gmra.mxu1 %v241_v60  ;;  %428 = vmatmul.bf16.vlgmr.msra.gmra.mxu3 %v245_v61 }
  0x43   : > { %736 = vperm.xlu1 %1163, %v701_v0  }
  0x46   : > { %745 = vperm.xlu0 %1162, %v704_v8  }
  0x4b   : > { %742 = vperm.xlu1 %1163, %v703_v7  }
  0x4f   : > { %364 = vmatmul.bf16.gmra.mxu0 %v242_v5  ;;  %384 = vmatmul.bf16.gmra.mxu2 %v246_v6 }
  0x50   : > { %413 = vmatmul.bf16.gmra.mxu1 %v242_v5  ;;  %433 = vmatmul.bf16.gmra.mxu3 %v246_v6 }
  0x53   : > { %748 = vperm.xlu1 %1163, %v705_v10  }
  0x5f   : > { %369 = vmatmul.bf16.gmra.mxu0 %v243_v16  ;;  %389 = vmatmul.bf16.gmra.mxu2 %v247_v17 }
  0x60   : > { %418 = vmatmul.bf16.gmra.mxu1 %v243_v16  ;;  %438 = vmatmul.bf16.gmra.mxu3 %v247_v17 }
  0x6f   : > { %374 = vmatmul.bf16.gmra.mxu0 %v244_v22  ;;  %394 = vmatmul.bf16.gmra.mxu2 %v248_v23 }
  0x70   : > { %423 = vmatmul.bf16.gmra.mxu1 %v244_v22  ;;  %443 = vmatmul.bf16.gmra.mxu3 %v248_v23 }
  0xbc   : > { %v360_v27 = vpop.f32.mrf.mxu0 }
  0xbd   : > { %v1444_v28 = vadd.f32 %v360_v27, %v1439_v25  ;;  %v409_v29 = vpop.f32.mrf.mxu1 }
  0xbe   : > { %v1447_v30 = vadd.f32 %v409_v29, %v1441_v26 }
  0xc0   : > { %v449_v31 = vmax.f32 %v1444_v28, %v1447_v30 }
  0xc2   : > { %450 = vmax.xlane.f32.xlu0 %v449_v31  ;;  %v380_v32 = vpop.f32.mrf.mxu2 }
  0xc3   : > { %v1452_v33 = vadd.f32 %v380_v32, %v1439_v25  ;;  %v429_v34 = vpop.f32.mrf.mxu3  ;;  %v1545_v32 = vand.u32 127, %v689_v20 }
  0xc4   : > { %v1455_v35 = vadd.f32 %v429_v34, %v1441_v26  ;;  %v362_v36 = vpop.f32.mrf.mxu0 }
  0xc5   : > { %v1458_v37 = vadd.f32 %v362_v36, %v1439_v25  ;;  %v411_v38 = vpop.f32.mrf.mxu1 }
  0xc6   : > { %v1461_v39 = vadd.f32 %v411_v38, %v1441_v26  ;;  %v473_v40 = vmax.f32 %v1452_v33, %v1455_v35 }
  0xc8   : > { %474 = vmax.xlane.f32.xlu2 %v473_v40  ;;  %v452_v41 = vmax.f32 %v1458_v37, %v1461_v39 }
  0xca   : > { %453 = vmax.xlane.f32.xlu0 %v452_v41  ;;  %v382_v42 = vpop.f32.mrf.mxu2  ;;  %v1553_v41 = vadd.s32 128, %v1545_v32 }
  0xcb   : > { %v431_v43 = vpop.f32.mrf.mxu3  ;;  %v1468_v44 = vadd.f32 %v382_v42, %v1439_v25 }
  0xcc   : > { %v1471_v45 = vadd.f32 %v431_v43, %v1441_v26  ;;  %v365_v46 = vpop.f32.mrf.mxu0 }
  0xcd   : > { %v1474_v47 = vadd.f32 %v365_v46, %v1439_v25  ;;  %v414_v48 = vpop.f32.mrf.mxu1 }
  0xce   : > { %v1477_v49 = vadd.f32 %v414_v48, %v1441_v26  ;;  %v476_v51 = vmax.f32 %v1468_v44, %v1471_v45 }
  0xd0   : > { %v455_v50 = vmax.f32 %v1474_v47, %v1477_v49 }
  0xd2   : > { %456 = vmax.xlane.f32.xlu1 %v455_v50  ;;  %477 = vmax.xlane.f32.xlu0 %v476_v51  ;;  %v385_v52 = vpop.f32.mrf.mxu2 }
  0xd3   : > { %v434_v53 = vpop.f32.mrf.mxu3  ;;  %v1484_v54 = vadd.f32 %v385_v52, %v1439_v25  ;;  %v710_v52 = vpop.permute.xlu0 %709 }
  0xd4   : > { %v1487_v55 = vadd.f32 %v434_v53, %v1441_v26  ;;  %v367_v56 = vpop.f32.mrf.mxu0  ;;  %vm756_vm0 = vcmp.eq.s32.totalorder %v1545_v32, %v710_v52  ;;  %vm757_vm1 = vcmp.eq.s32.totalorder %v1553_v41, %v710_v52 }
  0xd5   : > { %v416_v57 = vpop.f32.mrf.mxu1  ;;  %v1495_v62 = vadd.f32 %v367_v56, %v1439_v25  ;;  %v788_v56 = vsel %vm756_vm0, %v1444_v28, 0.0 }
  0xd6   : > { %v479_v58 = vmax.f32 %v1484_v54, %v1487_v55  ;;  %v1498_v63 = vadd.f32 %v416_v57, %v1441_v26  ;;  %v789_v57 = vsel %vm757_vm1, %v1447_v30, 0.0 }
  0xd8   : > { %v458_v6 = vmax.f32 %v1495_v62, %v1498_v63 }
  0xda   : > { %480 = vmax.xlane.f32.xlu1 %v479_v58  ;;  %v387_v59 = vpop.f32.mrf.mxu2  ;;  %v713_v58 = vpop.permute.xlu1 %712 }
  0xdb   : > { %v1492_v60 = vadd.f32 %v387_v59, %v1439_v25  ;;  %v436_v61 = vpop.f32.mrf.mxu3  ;;  %v820_v59 = vadd.f32 %v789_v57, %v788_v56  ;;  %vm758_vm2 = vcmp.eq.s32.totalorder %v1545_v32, %v713_v58  ;;  %vm759_vm3 = vcmp.eq.s32.totalorder %v1553_v41, %v713_v58  ;;  %v728_v20 = vpop.permute.xlu0 %727 }
  0xdc   : > { %v1501_v0 = vadd.f32 %v436_v61, %v1441_v26  ;;  %v370_v1 = vpop.f32.mrf.mxu0  ;;  %v706_v61 = vld [vmem:[%s1417_s10 + $0x70] sm:$0xff]  ;;  %vm768_vm8 = vcmp.eq.s32.totalorder %v1545_v32, %v728_v20  ;;  %vm769_vm9 = vcmp.eq.s32.totalorder %v1553_v41, %v728_v20 }
  0xdd   : > { %v419_v2 = vpop.f32.mrf.mxu1  ;;  %v1506_v4 = vadd.f32 %v370_v1, %v1439_v25  ;;  %v790_v1 = vsel %vm758_vm2, %v1458_v37, 0.0 }
  0xde   : > { %v482_v3 = vmax.f32 %v1492_v60, %v1501_v0  ;;  %v1509_v5 = vadd.f32 %v419_v2, %v1441_v26  ;;  %v791_v2 = vsel %vm759_vm3, %v1461_v39, 0.0 }
  0xe0   : > { %483 = vmax.xlane.f32.xlu2 %v482_v3  ;;  %v461_v12 = vmax.f32 %v1506_v4, %v1509_v5  ;;  %v823_v3 = vadd.f32 %v791_v2, %v790_v1 }
  0xe2   : > { %459 = vmax.xlane.f32.xlu1 %v458_v6  ;;  %v390_v7 = vpop.f32.mrf.mxu2  ;;  %v722_v6 = vpop.permute.xlu1 %721 }
  0xe3   : > { %v1514_v8 = vadd.f32 %v390_v7, %v1439_v25  ;;  %v439_v9 = vpop.f32.mrf.mxu3  ;;  %vm764_vm4 = vcmp.eq.s32.totalorder %v1545_v32, %v722_v6  ;;  %vm765_vm5 = vcmp.eq.s32.totalorder %v1553_v41, %v722_v6 }
  0xe4   : > { %v1517_v10 = vadd.f32 %v439_v9, %v1441_v26  ;;  %v372_v11 = vpop.f32.mrf.mxu0  ;;  %v796_v7 = vsel %vm764_vm4, %v1506_v4, 0.0  ;;  %v797_v9 = vsel %vm765_vm5, %v1509_v5, 0.0 }
  0xe5   : > { %v421_v13 = vpop.f32.mrf.mxu1  ;;  %v1524_v15 = vadd.f32 %v372_v11, %v1439_v25  ;;  %v832_v11 = vadd.f32 %v797_v9, %v796_v7 }
  0xe6   : > { %v485_v14 = vmax.f32 %v1514_v8, %v1517_v10  ;;  %v1527_v16 = vadd.f32 %v421_v13, %v1441_v26 }
  0xe8   : > { %462 = vmax.xlane.f32.xlu2 %v461_v12  ;;  %486 = vmax.xlane.f32.xlu0 %v485_v14  ;;  %v464_v29 = vmax.f32 %v1524_v15, %v1527_v16  ;;  %v707_v14 = vld [vmem:[%s1417_s10 + $0x78] sm:$0xff] }
  0xea   : > { %v392_v17 = vpop.f32.mrf.mxu2 }
  0xeb   : > { %v1530_v18 = vadd.f32 %v392_v17, %v1439_v25  ;;  %v441_v19 = vpop.f32.mrf.mxu3 }
  0xec   : > { %v1533_v21 = vadd.f32 %v441_v19, %v1441_v26  ;;  %v375_v22 = vpop.f32.mrf.mxu0 }
  0xed   : > { %v1536_v23 = vadd.f32 %v375_v22, %v1439_v25  ;;  %v424_v24 = vpop.f32.mrf.mxu1 }
  0xee   : > { %v1539_v27 = vadd.f32 %v424_v24, %v1441_v26  ;;  %v488_v31 = vmax.f32 %v1530_v18, %v1533_v21  ;;  %v725_v24 = vpop.permute.xlu1 %724 }
  0xef   : > { %v800_v52 = vsel %vm768_vm8, %v1536_v23, 0.0  ;;  %vm766_vm12 = vcmp.eq.s32.totalorder %v1545_v32, %v725_v24  ;;  %vm767_vm13 = vcmp.eq.s32.totalorder %v1553_v41, %v725_v24 }
  0xf0   : > { %465 = vmax.xlane.f32.xlu2 %v464_v29  ;;  %489 = vmax.xlane.f32.xlu1 %v488_v31  ;;  %v467_v34 = vmax.f32 %v1536_v23, %v1539_v27  ;;  %v716_v29 = vpop.permute.xlu2 %715  ;;  %v1590_v31 = vpop.permute.xlu0 %733  ;;  %v799_v24 = vsel %vm767_vm13, %v1527_v16, 0.0 }
  0xf1   : > { %vm760_vm10 = vcmp.eq.s32.totalorder %v1545_v32, %v716_v29  ;;  %vm761_vm11 = vcmp.eq.s32.totalorder %v1553_v41, %v716_v29  ;;  %v798_v29 = vsel %vm766_vm12, %v1524_v15, 0.0  ;;  %vm772_vm14 = vcmp.eq.s32.totalorder %v1545_v32, %v1590_v31 }
  0xf2   : > { %468 = vmax.xlane.f32.xlu0 %v467_v34  ;;  %v395_v36 = vpop.f32.mrf.mxu2  ;;  %v793_v6 = vsel %vm761_vm11, %v1477_v49, 0.0  ;;  %vm773_vm15 = vcmp.eq.s32.totalorder %v1553_v41, %v1590_v31 }
  0xf3   : > { %v1550_v38 = vadd.f32 %v395_v36, %v1439_v25  ;;  %v444_v40 = vpop.f32.mrf.mxu3 }
  0xf4   : > { %v1556_v42 = vadd.f32 %v444_v40, %v1441_v26  ;;  %v377_v43 = vpop.f32.mrf.mxu0 }
  0xf5   : > { %v1559_v46 = vadd.f32 %v377_v43, %v1439_v25  ;;  %v426_v48 = vpop.f32.mrf.mxu1 }
  0xf6   : > { %v1562_v50 = vadd.f32 %v426_v48, %v1441_v26  ;;  %v491_v51 = vmax.f32 %v1550_v38, %v1556_v42  ;;  %v1592_v34 = vpop.permute.xlu1 %730 }
  0xf7   : > { %vm770_vm2 = vcmp.eq.s32.totalorder %v1545_v32, %v1592_v34  ;;  %vm771_vm3 = vcmp.eq.s32.totalorder %v1553_v41, %v1592_v34 }
  0xf8   : > { %492 = vmax.xlane.f32.xlu2 %v491_v51  ;;  %v470_v53 = vmax.f32 %v1559_v46, %v1562_v50  ;;  %v1594_v36 = vpop.permute.xlu0 %739  ;;  %v719_v40 = vpop.permute.xlu2 %718 }
  0xf9   : > { %vm762_vm6 = vcmp.eq.s32.totalorder %v1545_v32, %v719_v40  ;;  %vm763_vm7 = vcmp.eq.s32.totalorder %v1553_v41, %v719_v40 }
  0xfa   : > { %471 = vmax.xlane.f32.xlu1 %v470_v53  ;;  %v397_v12 = vpop.f32.mrf.mxu2  ;;  %v801_v53 = vsel %vm769_vm9, %v1539_v27, 0.0 }
  0xfb   : > { %v446_v13 = vpop.f32.mrf.mxu3  ;;  %v1583_v17 = vadd.f32 %v397_v12, %v1439_v25  ;;  %v794_v25 = vsel %vm762_vm6, %v1495_v62, 0.0  ;;  %vm776_vm6 = vcmp.eq.s32.totalorder %v1545_v32, %v1594_v36 }
  0xfc   : > { %v1586_v19 = vadd.f32 %v446_v13, %v1441_v26  ;;  %v795_v26 = vsel %vm763_vm7, %v1498_v63, 0.0  ;;  %vm777_vm7 = vcmp.eq.s32.totalorder %v1553_v41, %v1594_v36 }
  0xfd   : > { %v829_v51 = vadd.f32 %v795_v26, %v794_v25 }
  0xfe   : > { %v494_v22 = vmax.f32 %v1583_v17, %v1586_v19  ;;  %v1600_v43 = vpop.permute.xlu1 %736 }
  0xff   : > { %vm774_vm0 = vcmp.eq.s32.totalorder %v1545_v32, %v1600_v43  ;;  %vm775_vm1 = vcmp.eq.s32.totalorder %v1553_v41, %v1600_v43 }
 0x100   : > { %821 = vadd.xlane.f32.xlu2 %v820_v59  ;;  %v1602_v48 = vpop.permute.xlu0 %745 }
 0x101   : > { %vm781_vm11 = vcmp.eq.s32.totalorder %v1553_v41, %v1602_v48 }
 0x106   : > { %751 = vperm.xlu0 %1162, %v706_v61   ;;  %v1610_v56 = vpop.permute.xlu1 %742  ;;  %v838_v61 = vadd.f32 %v801_v53, %v800_v52  ;;  %v835_v53 = vadd.f32 %v799_v24, %v798_v29 }
 0x107   : > { %vm778_vm4 = vcmp.eq.s32.totalorder %v1545_v32, %v1610_v56  ;;  %vm779_vm5 = vcmp.eq.s32.totalorder %v1553_v41, %v1610_v56 }
 0x108   : > { %824 = vadd.xlane.f32.xlu2 %v823_v3  ;;  %v792_v3 = vsel %vm760_vm10, %v1474_v47, 0.0  ;;  %vm780_vm10 = vcmp.eq.s32.totalorder %v1545_v32, %v1602_v48 }
 0x109   : > { %v826_v9 = vadd.f32 %v793_v6, %v792_v3 }
 0x110   : > { %833 = vadd.xlane.f32.xlu2 %v832_v11  ;;  %v1628_v11 = vpop.permute.xlu1 %748 }
 0x111   : > { %vm782_vm12 = vcmp.eq.s32.totalorder %v1545_v32, %v1628_v11  ;;  %vm783_vm13 = vcmp.eq.s32.totalorder %v1553_v41, %v1628_v11 }
 0x112   : > { %v815_v48 = vsel %vm783_vm13, %v1533_v21, 0.0 }
 0x113   : > { %754 = vperm.xlu1 %1163, %v707_v14  }
 0x118   : > { %495 = vmax.xlane.f32.xlu2 %v494_v22 }
 0x130   : > { %830 = vadd.xlane.f32.xlu0 %v829_v51 }
 0x135   : > { %v1612_v57 = vpop.xlane.xlu0 %450 }
 0x136   : > { %v497_v58 = vsub.f32 %v1444_v28, %v1612_v57  ;;  %v498_v59 = vsub.f32 %v1447_v30, %v1612_v57 }
 0x138   : > { %v529_v1 = vmul.f32 1.442695, %v497_v58  ;;  %v531_v2 = vmul.f32 1.442695, %v498_v59  ;;  %839 = vadd.xlane.f32.xlu0 %v838_v61 }
 0x13a   : > { %1165 = vpow2.f32 %v529_v1 }
 0x13b   : > { %1167 = vpow2.f32 %v531_v2  ;;  %v1620_v7 = vpop.xlane.xlu2 %474 }
 0x13c   : > { %v513_v28 = vsub.f32 %v1452_v33, %v1620_v7  ;;  %v514_v30 = vsub.f32 %v1455_v35, %v1620_v7 }
 0x13d   : > { %827 = vadd.xlane.f32.xlu1 %v826_v9  ;;  %v1630_v12 = vpop.xlane.xlu0 %453 }
 0x13e   : > { %v561_v13 = vmul.f32 1.442695, %v513_v28  ;;  %v563_v14 = vmul.f32 1.442695, %v514_v30  ;;  %v499_v20 = vsub.f32 %v1458_v37, %v1630_v12  ;;  %v500_v22 = vsub.f32 %v1461_v39, %v1630_v12 }
 0x140   : > { %v1166_v40 = vpop.eup %1165  ;;  %1169 = vpow2.f32 %v561_v13  ;;  %v533_v25 = vmul.f32 1.442695, %v499_v20  ;;  %v535_v26 = vmul.f32 1.442695, %v500_v22 }
 0x141   : > { %v1168_v51 = vpop.eup %1167  ;;  %1171 = vpow2.f32 %v563_v14 }
 0x142   : > { %1173 = vpow2.f32 %v533_v25  ;;  %v593_v52 = vadd.f32 %v1168_v51, %v1166_v40 }
 0x143   : > { %1175 = vpow2.f32 %v535_v26 }
 0x144   : > { %594 = vadd.xlane.f32.xlu2 %v593_v52 }
 0x145   : > { %836 = vadd.xlane.f32.xlu1 %v835_v53  ;;  %v1638_v37 = vpop.xlane.xlu1 %456  ;;  %v1640_v58 = vpop.xlane.xlu0 %477 }
 0x146   : > { %v1170_v39 = vpop.eup %1169  ;;  %v515_v59 = vsub.f32 %v1468_v44, %v1640_v58  ;;  %v516_v61 = vsub.f32 %v1471_v45, %v1640_v58  ;;  %v501_v3 = vsub.f32 %v1474_v47, %v1638_v37  ;;  %v502_v28 = vsub.f32 %v1477_v49, %v1638_v37 }
 0x147   : > { %v1172_v1 = vpop.eup %1171 }
 0x148   : > { %v1174_v2 = vpop.eup %1173  ;;  %v565_v6 = vmul.f32 1.442695, %v515_v59  ;;  %v567_v30 = vmul.f32 1.442695, %v516_v61  ;;  %v617_v13 = vadd.f32 %v1172_v1, %v1170_v39  ;;  %v537_v20 = vmul.f32 1.442695, %v501_v3 }
 0x149   : > { %v1176_v9 = vpop.eup %1175  ;;  %v539_v22 = vmul.f32 1.442695, %v502_v28 }
 0x14a   : > { %v596_v14 = vadd.f32 %v1176_v9, %v1174_v2  ;;  %1177 = vpow2.f32 %v565_v6 }
 0x14b   : > { %1179 = vpow2.f32 %v567_v30 }
 0x14c   : > { %618 = vadd.xlane.f32.xlu2 %v617_v13  ;;  %597 = vadd.xlane.f32.xlu0 %v596_v14  ;;  %1181 = vpow2.f32 %v537_v20 }
 0x14d   : > { %v1650_v29 = vpop.xlane.xlu1 %480  ;;  %1183 = vpow2.f32 %v539_v22 }
 0x14e   : > { %v517_v40 = vsub.f32 %v1484_v54, %v1650_v29  ;;  %v518_v47 = vsub.f32 %v1487_v55, %v1650_v29 }
 0x150   : > { %v569_v25 = vmul.f32 1.442695, %v517_v40  ;;  %v571_v49 = vmul.f32 1.442695, %v518_v47  ;;  %v1178_v26 = vpop.eup %1177 }
 0x151   : > { %v1180_v24 = vpop.eup %1179 }
 0x152   : > { %1185 = vpow2.f32 %v569_v25  ;;  %v620_v52 = vadd.f32 %v1180_v24, %v1178_v26  ;;  %v1182_v39 = vpop.eup %1181 }
 0x153   : > { %1187 = vpow2.f32 %v571_v49  ;;  %v1656_v51 = vpop.xlane.xlu2 %483  ;;  %v1184_v1 = vpop.eup %1183 }
 0x154   : > { %621 = vadd.xlane.f32.xlu1 %v620_v52  ;;  %v519_v3 = vsub.f32 %v1492_v60, %v1656_v51  ;;  %v520_v30 = vsub.f32 %v1501_v0, %v1656_v51 }
 0x155   : > { %v1658_v53 = vpop.xlane.xlu1 %459 }
 0x156   : > { %v503_v59 = vsub.f32 %v1495_v62, %v1658_v53  ;;  %v504_v61 = vsub.f32 %v1498_v63, %v1658_v53  ;;  %v573_v20 = vmul.f32 1.442695, %v519_v3  ;;  %v599_v63 = vadd.f32 %v1184_v1, %v1182_v39 }
 0x157   : > { %v575_v47 = vmul.f32 1.442695, %v520_v30 }
 0x158   : > { %v1186_v2 = vpop.eup %1185  ;;  %v541_v6 = vmul.f32 1.442695, %v503_v59  ;;  %v543_v9 = vmul.f32 1.442695, %v504_v61 }
 0x159   : > { %v1188_v28 = vpop.eup %1187 }
 0x15a   : > { %1189 = vpow2.f32 %v541_v6  ;;  %v623_v13 = vadd.f32 %v1188_v28, %v1186_v2 }
 0x15b   : > { %1191 = vpow2.f32 %v543_v9  ;;  %v1668_v14 = vpop.xlane.xlu2 %462  ;;  %v1670_v62 = vpop.xlane.xlu0 %486 }
 0x15c   : > { %624 = vadd.xlane.f32.xlu0 %v623_v13  ;;  %v521_v22 = vsub.f32 %v1514_v8, %v1670_v62  ;;  %v522_v40 = vsub.f32 %v1517_v10, %v1670_v62  ;;  %600 = vadd.xlane.f32.xlu1 %v599_v63  ;;  %1193 = vpow2.f32 %v573_v20  ;;  %v505_v24 = vsub.f32 %v1506_v4, %v1668_v14 }
 0x15d   : > { %1195 = vpow2.f32 %v575_v47  ;;  %v506_v39 = vsub.f32 %v1509_v5, %v1668_v14 }
 0x15e   : > { %v577_v25 = vmul.f32 1.442695, %v521_v22  ;;  %v579_v49 = vmul.f32 1.442695, %v522_v40  ;;  %v545_v1 = vmul.f32 1.442695, %v505_v24 }
 0x15f   : > { %v547_v2 = vmul.f32 1.442695, %v506_v39  ;;  %v805_v39 = vsel %vm773_vm15, %v1455_v35, 0.0 }
 0x160   : > { %v1190_v26 = vpop.eup %1189  ;;  %1197 = vpow2.f32 %v577_v25 }
 0x161   : > { %v1192_v52 = vpop.eup %1191  ;;  %1199 = vpow2.f32 %v579_v49 }
 0x162   : > { %v602_v59 = vadd.f32 %v1192_v52, %v1190_v26  ;;  %v1194_v6 = vpop.eup %1193  ;;  %1201 = vpow2.f32 %v545_v1  ;;  %v804_v52 = vsel %vm772_vm14, %v1452_v33, 0.0 }
 0x163   : > { %v1680_v61 = vpop.xlane.xlu2 %465  ;;  %v1682_v3 = vpop.xlane.xlu1 %489  ;;  %1203 = vpow2.f32 %v547_v2 }
 0x164   : > { %603 = vadd.xlane.f32.xlu2 %v602_v59  ;;  %v1196_v9 = vpop.eup %1195  ;;  %v507_v4 = vsub.f32 %v1524_v15, %v1680_v61  ;;  %v508_v5 = vsub.f32 %v1527_v16, %v1680_v61  ;;  %v523_v16 = vsub.f32 %v1530_v18, %v1682_v3  ;;  %v524_v31 = vsub.f32 %v1533_v21, %v1682_v3 }
 0x165   : > { %v626_v20 = vadd.f32 %v1196_v9, %v1194_v6  ;;  %v1694_v15 = vpop.xlane.xlu0 %468 }
 0x166   : > { %v1198_v28 = vpop.eup %1197  ;;  %v549_v22 = vmul.f32 1.442695, %v507_v4  ;;  %v551_v40 = vmul.f32 1.442695, %v508_v5  ;;  %v509_v59 = vsub.f32 %v1536_v23, %v1694_v15  ;;  %v510_v6 = vsub.f32 %v1539_v27, %v1694_v15 }
 0x167   : > { %v1200_v30 = vpop.eup %1199  ;;  %v581_v9 = vmul.f32 1.442695, %v523_v16 }
 0x168   : > { %v629_v13 = vadd.f32 %v1200_v30, %v1198_v28  ;;  %v1202_v25 = vpop.eup %1201  ;;  %1205 = vpow2.f32 %v549_v22  ;;  %v844_v28 = vadd.f32 %v805_v39, %v804_v52  ;;  %v583_v30 = vmul.f32 1.442695, %v524_v31 }
 0x169   : > { %v1204_v24 = vpop.eup %1203  ;;  %1207 = vpow2.f32 %v551_v40  ;;  %v553_v33 = vmul.f32 1.442695, %v509_v59  ;;  %v555_v35 = vmul.f32 1.442695, %v510_v6 }
 0x16a   : > { %630 = vadd.xlane.f32.xlu1 %v629_v13  ;;  %v605_v4 = vadd.f32 %v1204_v24, %v1202_v25 }
 0x16b   : > { %v1688_v63 = vpop.xlane.xlu2 %492 }
 0x16c   : > { %627 = vadd.xlane.f32.xlu2 %v626_v20  ;;  %v525_v31 = vsub.f32 %v1550_v38, %v1688_v63  ;;  %v526_v52 = vsub.f32 %v1556_v42, %v1688_v63 }
 0x16d   : > { %v1696_v47 = vpop.xlane.xlu1 %471 }
 0x16e   : > { %v511_v49 = vsub.f32 %v1559_v46, %v1696_v47  ;;  %v512_v26 = vsub.f32 %v1562_v50, %v1696_v47  ;;  %v1206_v13 = vpop.eup %1205  ;;  %v587_v6 = vmul.f32 1.442695, %v526_v52 }
 0x16f   : > { %v1208_v23 = vpop.eup %1207 }
 0x170   : > { %v557_v1 = vmul.f32 1.442695, %v511_v49  ;;  %v559_v2 = vmul.f32 1.442695, %v512_v26  ;;  %v608_v27 = vadd.f32 %v1208_v23, %v1206_v13  ;;  %v810_v23 = vsel %vm778_vm4, %v1492_v60, 0.0 }
 0x172   : > { %1209 = vpow2.f32 %v557_v1  ;;  %845 = vadd.xlane.f32.xlu1 %v844_v28  ;;  %v807_v28 = vsel %vm775_vm1, %v1471_v45, 0.0 }
 0x173   : > { %1211 = vpow2.f32 %v559_v2  ;;  %v1712_v5 = vpop.xlane.xlu2 %821  ;;  %v585_v2 = vmul.f32 1.442695, %v525_v31 }
 0x174   : > { %606 = vadd.xlane.f32.xlu2 %v605_v4  ;;  %1213 = vpow2.f32 %v581_v9  ;;  %v806_v9 = vsel %vm774_vm0, %v1468_v44, 0.0  ;;  %v802_v4 = vsel %vm770_vm2, %v1559_v46, 0.0  ;;  %vm884_vm0 = vcmask 7168  }
 0x175   : > { %1215 = vpow2.f32 %v583_v30  ;;  %v803_v30 = vsel %vm771_vm3, %v1562_v50, 0.0  ;;  %v847_v43 = vadd.f32 %v807_v28, %v806_v9 }
 0x176   : > { %1217 = vpow2.f32 %v553_v33  ;;  %v841_v33 = vadd.f32 %v803_v30, %v802_v4 }
 0x177   : > { %1219 = vpow2.f32 %v555_v35 }
 0x178   : > { %v1210_v20 = vpop.eup %1209  ;;  %1221 = vpow2.f32 %v585_v2 }
 0x179   : > { %v1212_v22 = vpop.eup %1211  ;;  %1223 = vpow2.f32 %v587_v6 }
 0x17a   : > { %v614_v40 = vadd.f32 %v1212_v22, %v1210_v20  ;;  %v1214_v25 = vpop.eup %1213  ;;  %v811_v20 = vsel %vm779_vm5, %v1501_v0, 0.0  ;;  %v752_v22 = vpop.permute.xlu0 %751  ;;  %v808_v0 = vsel %vm776_vm6, %v1484_v54, 0.0  ;;  %v812_v54 = vsel %vm780_vm10, %v1514_v8, 0.0 }
 0x17b   : > { %v1714_v16 = vpop.xlane.xlu2 %824  ;;  %v1216_v49 = vpop.eup %1215  ;;  %v853_v56 = vadd.f32 %v811_v20, %v810_v23  ;;  %vm784_vm8 = vcmp.eq.s32.totalorder %v1545_v32, %v752_v22  ;;  %vm785_vm9 = vcmp.eq.s32.totalorder %v1553_v41, %v752_v22 }
 0x17c   : > { %609 = vadd.xlane.f32.xlu2 %v608_v27  ;;  %615 = vadd.xlane.f32.xlu0 %v614_v40  ;;  %v1218_v26 = vpop.eup %1217  ;;  %v632_v39 = vadd.f32 %v1216_v49, %v1214_v25  ;;  %v809_v25 = vsel %vm777_vm7, %v1487_v55, 0.0  ;;  %v816_v49 = vsel %vm784_vm8, %v1550_v38, 0.0  ;;  %v813_v55 = vsel %vm781_vm11, %v1517_v10, 0.0 }
 0x17d   : > { %v1220_v24 = vpop.eup %1219  ;;  %v850_v36 = vadd.f32 %v809_v25, %v808_v0  ;;  %v856_v52 = vadd.f32 %v813_v55, %v812_v54 }
 0x17e   : > { %v611_v59 = vadd.f32 %v1220_v24, %v1218_v26  ;;  %v1222_v46 = vpop.eup %1221  ;;  %v817_v26 = vsel %vm785_vm9, %v1556_v42, 0.0  ;;  %v814_v42 = vsel %vm782_vm12, %v1530_v18, 0.0 }
 0x17f   : > { %v1224_v13 = vpop.eup %1223  ;;  %v862_v31 = vadd.f32 %v817_v26, %v816_v49 }
 0x180   : > { %v635_v27 = vadd.f32 %v1224_v13, %v1222_v46 }
 0x183   : > { %v1720_v1 = vpop.xlane.xlu2 %833 }
 0x184   : > { %633 = vadd.xlane.f32.xlu0 %v632_v39  ;;  %612 = vadd.xlane.f32.xlu2 %v611_v59  ;;  %v859_v39 = vadd.f32 %v815_v48, %v814_v42 }
 0x185   : > { %v755_v38 = vpop.permute.xlu1 %754 }
 0x186   : > { %vm786_vm14 = vcmp.eq.s32.totalorder %v1545_v32, %v755_v38  ;;  %vm787_vm15 = vcmp.eq.s32.totalorder %v1553_v41, %v755_v38 }
 0x187   : > { %v818_v11 = vsel %vm786_vm14, %v1583_v17, 0.0  ;;  %v819_v59 = vsel %vm787_vm15, %v1586_v19, 0.0 }
 0x188   : > { %v865_v8 = vadd.f32 %v819_v59, %v818_v11 }
 0x18b   : > { %v1736_v35 = vpop.xlane.xlu2 %495 }
 0x18c   : > { %v527_v44 = vsub.f32 %v1583_v17, %v1736_v35  ;;  %v528_v45 = vsub.f32 %v1586_v19, %v1736_v35  ;;  %848 = vadd.xlane.f32.xlu0 %v847_v43  ;;  %842 = vadd.xlane.f32.xlu2 %v841_v33 }
 0x18e   : > { %v589_v50 = vmul.f32 1.442695, %v527_v44  ;;  %v591_v34 = vmul.f32 1.442695, %v528_v45 }
 0x190   : > { %1225 = vpow2.f32 %v589_v50 }
 0x191   : > { %1227 = vpow2.f32 %v591_v34 }
 0x194   : > { %854 = vadd.xlane.f32.xlu0 %v853_v56  ;;  %636 = vadd.xlane.f32.xlu2 %v635_v27 }
 0x196   : > { %v1226_v60 = vpop.eup %1225 }
 0x197   : > { %v1228_v40 = vpop.eup %1227 }
 0x198   : > { %v638_v24 = vadd.f32 %v1228_v40, %v1226_v60 }
 0x19a   : > { %639 = vadd.xlane.f32.xlu1 %v638_v24 }
 0x19c   : > { %851 = vadd.xlane.f32.xlu2 %v850_v36  ;;  %863 = vadd.xlane.f32.xlu0 %v862_v31 }
 0x1a2   : > { %857 = vadd.xlane.f32.xlu1 %v856_v52 }
 0x1a3   : > { %v831_v6 = vpop.xlane.xlu0 %830 }
 0x1a4   : > { %860 = vadd.xlane.f32.xlu2 %v859_v39 }
 0x1aa   : > { %866 = vadd.xlane.f32.xlu1 %v865_v8 }
 0x1ab   : > { %v1774_v28 = vpop.xlane.xlu0 %839 }
 0x1b0   : > { %v828_v2 = vpop.xlane.xlu1 %827 }
 0x1b7   : > { %v595_v10 = vpop.xlane.xlu2 %594 }
 0x1b8   : > { %v1772_v9 = vpop.xlane.xlu1 %836 }
 0x1bf   : > { %v619_v18 = vpop.xlane.xlu2 %618  ;;  %v598_v4 = vpop.xlane.xlu0 %597 }
 0x1c0   : > { %1229 = vlog2.f32 %v598_v4 }
 0x1c1   : > { %1231 = vlog2.f32 %v595_v10 }
 0x1c6   : > { %v1230_v43 = vpop.eup %1229 }
 0x1c7   : > { %v622_v32 = vpop.xlane.xlu1 %621  ;;  %v1232_v33 = vpop.eup %1231  ;;  %v644_v45 = vmul.f32 0.6931472, %v1230_v43 }
 0x1c8   : > { %v642_v50 = vmul.f32 0.6931472, %v1232_v33 }
 0x1c9   : > { %v674_v20 = vadd.f32 %v644_v45, %v1630_v12 }
 0x1ca   : > { %v673_v27 = vadd.f32 %v642_v50, %v1612_v57 }
 0x1cb   : > { %v869_v0 = vsub.f32 %v674_v20, %v1714_v16 }
 0x1cc   : > { %v868_v26 = vsub.f32 %v673_v27, %v1712_v5 }
 0x1cd   : > { %v886_v57 = vsel %vm884_vm0, %v869_v0, 0.0 }
 0x1cf   : > { %v601_v30 = vpop.xlane.xlu1 %600  ;;  %v625_v19 = vpop.xlane.xlu0 %624 }
 0x1d0   : > { %1233 = vlog2.f32 %v601_v30 }
 0x1d6   : > { %v1234_v44 = vpop.eup %1233 }
 0x1d7   : > { %v604_v21 = vpop.xlane.xlu2 %603  ;;  %v646_v34 = vmul.f32 0.6931472, %v1234_v44 }
 0x1d8   : > { %1235 = vlog2.f32 %v604_v21 }
 0x1d9   : > { %v675_v60 = vadd.f32 %v646_v34, %v1638_v37 }
 0x1db   : > { %v870_v24 = vsub.f32 %v675_v60, %v828_v2 }
 0x1dd   : > { %v888_v55 = vsel %vm884_vm0, %v870_v24, 0.0  ;;  %v631_v38 = vpop.xlane.xlu1 %630 }
 0x1de   : > { %v1236_v46 = vpop.eup %1235 }
 0x1df   : > { %v1776_v41 = vpop.xlane.xlu2 %627  ;;  %v648_v22 = vmul.f32 0.6931472, %v1236_v46 }
 0x1e1   : > { %v676_v25 = vadd.f32 %v648_v22, %v1658_v53  ;;  %v885_v53 = vsel %vm884_vm0, %v868_v26, 0.0 }
 0x1e3   : > { %v871_v37 = vsub.f32 %v676_v25, %v831_v6 }
 0x1e5   : > { %v890_v48 = vsel %vm884_vm0, %v871_v37, 0.0  ;;  %v846_v33 = vpop.xlane.xlu1 %845 }
 0x1e7   : > { %v607_v17 = vpop.xlane.xlu2 %606 }
 0x1e8   : > { %1237 = vlog2.f32 %v607_v17 }
 0x1ee   : > { %v1238_v23 = vpop.eup %1237 }
 0x1ef   : > { %v610_v13 = vpop.xlane.xlu2 %609  ;;  %v616_v56 = vpop.xlane.xlu0 %615  ;;  %v650_v40 = vmul.f32 0.6931472, %v1238_v23 }
 0x1f0   : > { %1239 = vlog2.f32 %v610_v13 }
 0x1f1   : > { %1241 = vlog2.f32 %v616_v56  ;;  %v677_v36 = vadd.f32 %v650_v40, %v1668_v14  ;;  %v887_v14 = vadd.f32 %v886_v57, %v885_v53 }
 0x1f3   : > { %v872_v5 = vsub.f32 %v677_v36, %v1720_v1  ;;  %v889_v11 = vadd.f32 %v888_v55, %v887_v14 }
 0x1f5   : > { %v891_v6 = vadd.f32 %v890_v48, %v889_v11 }
 0x1f6   : > { %v1240_v49 = vpop.eup %1239 }
 0x1f7   : > { %v652_v31 = vmul.f32 0.6931472, %v1240_v49  ;;  %v613_v12 = vpop.xlane.xlu2 %612  ;;  %v1242_v16 = vpop.eup %1241 }
 0x1f8   : > { %1243 = vlog2.f32 %v613_v12  ;;  %v634_v42 = vpop.xlane.xlu0 %633  ;;  %v656_v59 = vmul.f32 0.6931472, %v1242_v16 }
 0x1f9   : > { %1245 = vlog2.f32 %v619_v18  ;;  %v678_v54 = vadd.f32 %v652_v31, %v1680_v61  ;;  %v892_v61 = vsel %vm884_vm0, %v872_v5, 0.0 }
 0x1fa   : > { %1247 = vlog2.f32 %v622_v32  ;;  %v893_v32 = vadd.f32 %v892_v61, %v891_v6  ;;  %v680_v4 = vadd.f32 %v656_v59, %v1696_v47 }
 0x1fb   : > { %v873_v52 = vsub.f32 %v678_v54, %v1772_v9  ;;  %1249 = vlog2.f32 %v625_v19 }
 0x1fc   : > { %1251 = vlog2.f32 %v1776_v41 }
 0x1fd   : > { %v894_v18 = vsel %vm884_vm0, %v873_v52, 0.0  ;;  %1253 = vlog2.f32 %v631_v38 }
 0x1fe   : > { %v1244_v39 = vpop.eup %1243  ;;  %v895_v43 = vadd.f32 %v894_v18, %v893_v32  ;;  %1255 = vlog2.f32 %v634_v42 }
 0x1ff   : > { %v1246_v8 = vpop.eup %1245  ;;  %v654_v10 = vmul.f32 0.6931472, %v1244_v39  ;;  %v843_v2 = vpop.xlane.xlu2 %842 }
 0x200   : > { %v658_v21 = vmul.f32 0.6931472, %v1246_v8  ;;  %v1248_v30 = vpop.eup %1247  ;;  %v875_v17 = vsub.f32 %v680_v4, %v843_v2  ;;  %v849_v45 = vpop.xlane.xlu0 %848 }
 0x201   : > { %v679_v1 = vadd.f32 %v654_v10, %v1694_v15  ;;  %v660_v19 = vmul.f32 0.6931472, %v1248_v30  ;;  %v1250_v15 = vpop.eup %1249 }
 0x202   : > { %v681_v46 = vadd.f32 %v658_v21, %v1620_v7  ;;  %v898_v47 = vsel %vm884_vm0, %v875_v17, 0.0  ;;  %v1252_v41 = vpop.eup %1251 }
 0x203   : > { %v874_v9 = vsub.f32 %v679_v1, %v1774_v28  ;;  %v662_v28 = vmul.f32 0.6931472, %v1250_v15  ;;  %v682_v20 = vadd.f32 %v660_v19, %v1640_v58  ;;  %v664_v22 = vmul.f32 0.6931472, %v1252_v41  ;;  %v1254_v60 = vpop.eup %1253 }
 0x204   : > { %v876_v13 = vsub.f32 %v681_v46, %v846_v33  ;;  %v1256_v0 = vpop.eup %1255  ;;  %v666_v36 = vmul.f32 0.6931472, %v1254_v60 }
 0x205   : > { %v896_v44 = vsel %vm884_vm0, %v874_v9, 0.0  ;;  %v877_v27 = vsub.f32 %v682_v20, %v849_v45  ;;  %v683_v25 = vadd.f32 %v662_v28, %v1650_v29  ;;  %v684_v12 = vadd.f32 %v664_v22, %v1656_v51 }
 0x206   : > { %v897_v50 = vadd.f32 %v896_v44, %v895_v43  ;;  %v900_v56 = vsel %vm884_vm0, %v876_v13, 0.0  ;;  %v668_v37 = vmul.f32 0.6931472, %v1256_v0  ;;  %v685_v38 = vadd.f32 %v666_v36, %v1670_v62 }
 0x207   : > { %v637_v34 = vpop.xlane.xlu2 %636  ;;  %v902_v31 = vsel %vm884_vm0, %v877_v27, 0.0 }
 0x208   : > { %v899_v23 = vadd.f32 %v898_v47, %v897_v50  ;;  %1257 = vlog2.f32 %v637_v34  ;;  %v855_v26 = vpop.xlane.xlu0 %854  ;;  %v686_v52 = vadd.f32 %v668_v37, %v1682_v3 }
 0x209   : > { %v879_v16 = vsub.f32 %v684_v12, %v855_v26 }
 0x20a   : > { %v901_v7 = vadd.f32 %v900_v56, %v899_v23 }
 0x20b   : > { %v906_v42 = vsel %vm884_vm0, %v879_v16, 0.0 }
 0x20c   : > { %v903_v57 = vadd.f32 %v902_v31, %v901_v7 }
 0x20d   : > { %v640_v40 = vpop.xlane.xlu1 %639 }
 0x20e   : > { %v1258_v49 = vpop.eup %1257  ;;  %1259 = vlog2.f32 %v640_v40 }
 0x20f   : > { %v852_v24 = vpop.xlane.xlu2 %851  ;;  %v670_v54 = vmul.f32 0.6931472, %v1258_v49 }
 0x210   : > { %v878_v58 = vsub.f32 %v683_v25, %v852_v24  ;;  %v864_v61 = vpop.xlane.xlu0 %863 }
 0x211   : > { %v687_v14 = vadd.f32 %v670_v54, %v1688_v63 }
 0x212   : > { %v904_v53 = vsel %vm884_vm0, %v878_v58, 0.0 }
 0x213   : > { %v905_v55 = vadd.f32 %v904_v53, %v903_v57  ;;  %v882_v2 = vsub.f32 %v687_v14, %v864_v61 }
 0x214   : > { %v1260_v29 = vpop.eup %1259 }
 0x215   : > { %v858_v5 = vpop.xlane.xlu1 %857  ;;  %v907_v51 = vadd.f32 %v906_v42, %v905_v55  ;;  %v672_v11 = vmul.f32 0.6931472, %v1260_v29  ;;  %v912_v63 = vsel %vm884_vm0, %v882_v2, 0.0 }
 0x216   : > { %v880_v48 = vsub.f32 %v685_v38, %v858_v5 }
 0x217   : > { %v861_v39 = vpop.xlane.xlu2 %860  ;;  %v688_v18 = vadd.f32 %v672_v11, %v1736_v35 }
 0x218   : > { %v908_v59 = vsel %vm884_vm0, %v880_v48, 0.0  ;;  %v881_v8 = vsub.f32 %v686_v52, %v861_v39 }
 0x219   : > { %v909_v10 = vadd.f32 %v908_v59, %v907_v51 }
 0x21a   : > { %v910_v62 = vsel %vm884_vm0, %v881_v8, 0.0 }
 0x21b   : > { %v911_v6 = vadd.f32 %v910_v62, %v909_v10 }
 0x21d   : > { %v867_v1 = vpop.xlane.xlu1 %866  ;;  %v913_v32 = vadd.f32 %v912_v63, %v911_v6 }
 0x21e   : > { %v883_v21 = vsub.f32 %v688_v18, %v867_v1 }
 0x220   : > { %v914_v3 = vsel %vm884_vm0, %v883_v21, 0.0 }
 0x221   : > { %v915_v4 = vadd.f32 %v914_v3, %v913_v32 }
 0x223   : > { %916 = vadd.xlane.f32.xlu2 %v915_v4 }
 0x296   : > { %v917_v30 = vpop.xlane.xlu2 %916 }
 0x297   : > { %v918_v9 = vrot.slane %v917_v30, 4 }
 0x299   : > { %v919_v17 = vadd.f32 %v918_v9, %v917_v30 }
 0x29b   : > { %v920_v43 = vrot.slane %v919_v17, 2 }
 0x29d   : > { %v921_v33 = vadd.f32 %v920_v43, %v919_v17 }
 0x29f   : > { %v922_v44 = vrot.slane %v921_v33, 1 }
 0x2a1   : > { %v923_v45 = vadd.f32 %v922_v44, %v921_v33 }
 0x2a3   : > { %1121 = vpush %v923_v45 }
 0x2d1   : > { %929 = sbr.rel (%p1012_p2) target bundleno = 728 (0x2d8), region = 51 }
 0x2d4   : > { %s1122_s20 = spop %1121 }
 0x2d5   : > { %v925_v19 = vstv %s1122_s20 }
 0x2d6   : > { %vm930_vm1 = vcmask 0   ;;  %v1362_v35 = vmov 0.0  }
 0x2d7   : > { %931 = vst.msk [vmem:[#allocation8] sm:$0x1] %vm930_vm1, %v1362_v35 }
 0x2d8 PF: > { %vm934_vm2 = vcmask 0   ;;  %p1084_p9 = scmp.ne.s32.totalorder %s1406_s25, 1 }
 0x2dd   : > { %939 = sbr.rel (%p1084_p9) target bundleno = 748 (0x2ec), region = 55 }
 0x2de   : > { %v932_v46 = vld [vmem:[#allocation8] sm:$0x1] }
 0x2df   : > { %v933_v50 = vadd.f32 %v932_v46, %v925_v19 }
 0x2e1   : > { %935 = vst.msk [vmem:[#allocation8] sm:$0x1] %vm934_vm2, %v933_v50 }
 0x2e8   : > { %v940_v15 = vld [vmem:[#allocation8] sm:$0x1] }
 0x2e9   : > { %v941_v34 = vmul.f32 0.00390625, %v940_v15 }
 0x2eb   : > { %942 = vst.msk [vmem:[#allocation8] sm:$0x1] %vm934_vm2, %v941_v34 }
 0x2ec PF: > { %p1137_p10 = scmp.eq.s32.totalorder %s1406_s25, 1  ;;  %s1363_s21 = smov [#allocation8]  }
 0x2ed   : > { %s949_s23 = sshll.u32 %s1363_s21, 4  ;;  %s951_s26 = sshll.u32 %s1831_s5, 4  ;;  %s950_s23 = int_to_ptr.vmem [resolvable:$true] %s949_s23  ;;  %s952_s26 = int_to_ptr.hbm [resolvable:$true] %s951_s26 }
 0x2ee   : > { %1128 = dma.vmem_to_hbm [thread:$0]  (%p1137_p10), %s950_s23, 16, %s952_s26, [#allocation7]  }
 0x2ef   : > { %1346 = dma.done.wait (%p1137_p10), [#allocation7], 16  }
 0x2f0   : > { %1348 = vsyncadd (%p1137_p10), [#allocation7], 4294967280 }
 0x2f1 PF: > { %s25_s22 = sadd.s32 1, %s1351_s22  }
 0x2f2   : > { %p22_p11 = scmp.ge.s32.totalorder %s25_s22, 4  }
 0x2f4   :  { %24 = sbr.rel (!%p22_p11) target bundleno = 8 (0x8), region = 96 }
 0x2f9   :  { %965 = vsyncpa [#allocation6], 1 }
 0x2fa   :  { %967 = vsyncpa [#allocation6 + $0x1], 1 }
 0x2fb   :  { %968 = vsyncpa [#allocation7], 1 }
 0x2fc   :  { %970 = vsyncpa [#allocation7 + $0x1], 1 }

</bundles_post_ra>
